<compile_context>
chip_gen: v7x
topology: tpu7x:2x2x1
jax: 0.10.0
libtpu: 0.0.40
codegen_flags: <defaults>
</compile_context>

<pallas_src>
import jax
import jax.numpy as jnp
from jax.experimental import pallas as pl
from jax.experimental.pallas import tpu as pltpu


def se2d_kernel(x_ref, w1t_ref, b1_ref, w2t_ref, b2_ref, o_ref):
    # x_ref: (BN, C, HW) block holding BN batch elements.
    x = x_ref[...]

    # Squeeze: global average pool over the flattened spatial axis.
    # Accumulate in f32 regardless of the I/O dtype.
    xm = jnp.mean(x.astype(jnp.float32), axis=2)                       # (BN, C)

    # conv_reduce (1x1 conv == matmul): (BN, C) @ (C, Cr) + (1, Cr)
    s = jnp.dot(xm, w1t_ref[...], preferred_element_type=jnp.float32) + b1_ref[...]
    s = s * jax.nn.sigmoid(s)                                          # SiLU, (BN, Cr)

    # conv_expand: (BN, Cr) @ (Cr, C) + (1, C)
    s = jnp.dot(s, w2t_ref[...], preferred_element_type=jnp.float32) + b2_ref[...]

    # gate_fn = sigmoid; single broadcast, single lane-dense store.
    gate = jax.nn.sigmoid(s).astype(x.dtype)                           # (BN, C)
    o_ref[...] = (x * gate[:, :, None]).astype(o_ref.dtype)


def _choose_bn(n, c, hw, itemsize, block_budget_bytes):
    """Pick how many batch elements to process per grid step."""
    per_batch = c * hw * itemsize
    # Double-buffered input + output blocks dominate VMEM: ~4 * BN * per_batch.
    bn = max(1, block_budget_bytes // (4 * per_batch))
    bn = int(min(bn, n))
    # Keep at least 2 grid steps when possible so v7x's 2 TensorCores both get
    # work (batch axis is "parallel"); costs nothing on single-TC v5e/v6e.
    if n >= 2 and pl.cdiv(n, bn) < 2:
        bn = (n + 1) // 2
    return bn


def se2d_pallas(x_nchw, w_reduce, b_reduce, w_expand, b_expand,
                *, block_budget_bytes=24 << 20, vmem_limit_bytes=32 << 20):
    """SE2D forward.

    x_nchw: (N, C, H, W), f32 or bf16.  Weights follow PyTorch Conv2d 1x1
    conventions squeezed to 2D: w_reduce (Cr, C), b_reduce (Cr,),
    w_expand (C, Cr), b_expand (C,).  HW should be a multiple of 128 for
    unmasked lane-dense stores (correct either way).
    """
    N, C, H, W = x_nchw.shape
    Cr = w_reduce.shape[0]
    HW = H * W

    x = x_nchw.reshape(N, C, HW)
    # Pre-transpose weights outside the kernel (no in-kernel XLU transposes)
    # and keep the tiny SE math in f32.
    w1t = w_reduce.astype(jnp.float32).T            # (C, Cr)
    w2t = w_expand.astype(jnp.float32).T            # (Cr, C)
    b1 = b_reduce.astype(jnp.float32).reshape(1, Cr)
    b2 = b_expand.astype(jnp.float32).reshape(1, C)

    BN = _choose_bn(N, C, HW, jnp.dtype(x.dtype).itemsize, block_budget_bytes)
    grid = (pl.cdiv(N, BN),)   # partial last block is masked by Pallas if BN∤N

    out = pl.pallas_call(
        se2d_kernel,
        out_shape=jax.ShapeDtypeStruct((N, C, HW), x.dtype),
        grid_spec=pltpu.PrefetchScalarGridSpec(
            num_scalar_prefetch=0,
            grid=grid,
            in_specs=[
                pl.BlockSpec((BN, C, HW), lambda n: (n, 0, 0)),   # x (BN batches)
                pl.BlockSpec((C, Cr), lambda n: (0, 0)),           # w_reduce^T (resident)
                pl.BlockSpec((1, Cr), lambda n: (0, 0)),           # b_reduce
                pl.BlockSpec((Cr, C), lambda n: (0, 0)),           # w_expand^T (resident)
                pl.BlockSpec((1, C), lambda n: (0, 0)),            # b_expand
            ],
            out_specs=pl.BlockSpec((BN, C, HW), lambda n: (n, 0, 0)),
        ),
        compiler_params=pltpu.CompilerParams(
            dimension_semantics=("parallel",),
            vmem_limit_bytes=vmem_limit_bytes,
        ),
    )(x, w1t, b1, w2t, b2)

    return out.reshape(N, C, H, W)


def se2d_reference(x, w_reduce, b_reduce, w_expand, b_expand):
    # Pure-JAX reference mirroring the PyTorch forward (f32 math).
    x = x.astype(jnp.float32)
    x_se = jnp.mean(x, axis=(2, 3), keepdims=True)                      # (N, C, 1, 1)
    x_se = jnp.einsum('nchw,rc->nrhw', x_se, w_reduce) + b_reduce[None, :, None, None]
    x_se = x_se * jax.nn.sigmoid(x_se)                                  # SiLU
    x_se = jnp.einsum('nrhw,cr->nchw', x_se, w_expand) + b_expand[None, :, None, None]
    return x * jax.nn.sigmoid(x_se)


if __name__ == "__main__":
    key = jax.random.PRNGKey(0)

    # --- test 1: f32, in_ch=16 -> reduced_ch = int(16*0.25/1) = 4 -------------
    N, C, H, W = 2, 16, 16, 16
    Cr = int(C * 0.25 / 1)
    k_x, k_w1, k_b1, k_w2, k_b2, k_x2 = jax.random.split(key, 6)
    x = jax.random.normal(k_x, (N, C, H, W), dtype=jnp.float32)
    w_reduce = jax.random.normal(k_w1, (Cr, C), dtype=jnp.float32) * 0.1
    b_reduce = jax.random.normal(k_b1, (Cr,), dtype=jnp.float32) * 0.1
    w_expand = jax.random.normal(k_w2, (C, Cr), dtype=jnp.float32) * 0.1
    b_expand = jax.random.normal(k_b2, (C,), dtype=jnp.float32) * 0.1

    out = jax.block_until_ready(se2d_pallas(x, w_reduce, b_reduce, w_expand, b_expand))
    ref = se2d_reference(x, w_reduce, b_reduce, w_expand, b_expand)
    assert out.shape == (N, C, H, W)
    assert jnp.allclose(out, ref, atol=1e-5, rtol=1e-5), "f32 mismatch vs reference"

    # --- test 2: odd N (exercises BN batching + masked partial last block) ----
    N2, C2 = 5, 8
    Cr2 = int(C2 * 0.25 / 1)
    x2 = jax.random.normal(k_x2, (N2, C2, H, W), dtype=jnp.float32)
    out2 = jax.block_until_ready(
        se2d_pallas(x2, w_reduce[:Cr2, :C2], b_reduce[:Cr2],
                    w_expand[:C2, :Cr2], b_expand[:C2]))
    ref2 = se2d_reference(x2, w_reduce[:Cr2, :C2], b_reduce[:Cr2],
                          w_expand[:C2, :Cr2], b_expand[:C2])
    assert jnp.allclose(out2, ref2, atol=1e-5, rtol=1e-5), "odd-N mismatch vs reference"

    # --- test 3: bf16 I/O variant (halves HBM traffic; math stays f32) --------
    x_bf16 = x.astype(jnp.bfloat16)
    out_bf = jax.block_until_ready(
        se2d_pallas(x_bf16, w_reduce, b_reduce, w_expand, b_expand))
    ref_bf = se2d_reference(x_bf16, w_reduce, b_reduce, w_expand, b_expand)
    assert out_bf.dtype == jnp.bfloat16
    assert jnp.allclose(out_bf.astype(jnp.float32), ref_bf, atol=5e-2, rtol=5e-2), \
        "bf16 mismatch vs reference"

    print("KERNEL_OK")
</pallas_src>

<mosaic_0001>
module attributes {stable_mosaic.version = 11 : i64} {
  func.func @se2d_kernel(%arg0: i32, %arg1: memref<1x16x256xf32, #tpu.memory_space<vmem>>, %arg2: memref<16x4xf32, #tpu.memory_space<vmem>>, %arg3: memref<1x4xf32, #tpu.memory_space<vmem>>, %arg4: memref<4x16xf32, #tpu.memory_space<vmem>>, %arg5: memref<1x16xf32, #tpu.memory_space<vmem>>, %arg6: memref<1x16x256xf32, #tpu.memory_space<vmem>>) attributes {dimension_semantics = [#tpu.dimension_semantics<parallel>], iteration_bounds = array<i64: 2>, scalar_prefetch = 0 : i64, scratch_operands = 0 : i64, tpu.core_type = #tpu.core_type<tc>, window_params = [{transform_indices = @transform_0, window_bounds = array<i64: 1, 16, 256>}, {pipeline_mode = #tpu.pipeline_mode<synchronous>, transform_indices = @transform_1, window_bounds = array<i64: 16, 4>}, {pipeline_mode = #tpu.pipeline_mode<synchronous>, transform_indices = @transform_2, window_bounds = array<i64: 1, 4>}, {pipeline_mode = #tpu.pipeline_mode<synchronous>, transform_indices = @transform_3, window_bounds = array<i64: 4, 16>}, {pipeline_mode = #tpu.pipeline_mode<synchronous>, transform_indices = @transform_4, window_bounds = array<i64: 1, 16>}, {transform_indices = @transform_5, window_bounds = array<i64: 1, 16, 256>}]} {
    %c0 = arith.constant 0 : index
    %c0_0 = arith.constant 0 : index
    %c0_1 = arith.constant 0 : index
    %0 = vector.load %arg1[%c0, %c0_0, %c0_1] : memref<1x16x256xf32, #tpu.memory_space<vmem>>, vector<1x16x256xf32>
    %cst = arith.constant dense<0.000000e+00> : vector<1x16xf32>
    %1 = vector.multi_reduction <add>, %0, %cst [2] : vector<1x16x256xf32> to vector<1x16xf32>
    %cst_2 = arith.constant 2.560000e+02 : f32
    %2 = vector.broadcast %cst_2 : f32 to vector<1x16xf32>
    %3 = arith.divf %1, %2 : vector<1x16xf32>
    %c0_3 = arith.constant 0 : index
    %c0_4 = arith.constant 0 : index
    %4 = vector.load %arg2[%c0_3, %c0_4] : memref<16x4xf32, #tpu.memory_space<vmem>>, vector<16x4xf32>
    %cst_5 = arith.constant dense<0.000000e+00> : vector<1x4xf32>
    %5 = tpu.matmul %3, %4, %cst_5 {dimension_numbers = #tpu.dot_dimension_numbers<[1], [0], [0], [1], [0, 0, 1, 1], [], []>} : vector<1x16xf32>, vector<16x4xf32>, vector<1x4xf32> -> vector<1x4xf32>
    %c0_6 = arith.constant 0 : index
    %c0_7 = arith.constant 0 : index
    %6 = vector.load %arg3[%c0_6, %c0_7] : memref<1x4xf32, #tpu.memory_space<vmem>>, vector<1x4xf32>
    %7 = arith.addf %5, %6 : vector<1x4xf32>
    %8 = arith.negf %7 : vector<1x4xf32>
    %9 = math.exp %8 : vector<1x4xf32>
    %cst_8 = arith.constant 1.000000e+00 : f32
    %10 = vector.broadcast %cst_8 : f32 to vector<1x4xf32>
    %11 = arith.addf %10, %9 : vector<1x4xf32>
    %12 = arith.divf %10, %11 : vector<1x4xf32>
    %13 = arith.mulf %7, %12 : vector<1x4xf32>
    %c0_9 = arith.constant 0 : index
    %c0_10 = arith.constant 0 : index
    %14 = vector.load %arg4[%c0_9, %c0_10] : memref<4x16xf32, #tpu.memory_space<vmem>>, vector<4x16xf32>
    %cst_11 = arith.constant dense<0.000000e+00> : vector<1x16xf32>
    %15 = tpu.matmul %13, %14, %cst_11 {dimension_numbers = #tpu.dot_dimension_numbers<[1], [0], [0], [1], [0, 0, 1, 1], [], []>} : vector<1x4xf32>, vector<4x16xf32>, vector<1x16xf32> -> vector<1x16xf32>
    %c0_12 = arith.constant 0 : index
    %c0_13 = arith.constant 0 : index
    %16 = vector.load %arg5[%c0_12, %c0_13] : memref<1x16xf32, #tpu.memory_space<vmem>>, vector<1x16xf32>
    %17 = arith.addf %15, %16 : vector<1x16xf32>
    %18 = arith.negf %17 : vector<1x16xf32>
    %19 = math.exp %18 : vector<1x16xf32>
    %cst_14 = arith.constant 1.000000e+00 : f32
    %20 = vector.broadcast %cst_14 : f32 to vector<1x16xf32>
    %21 = arith.addf %20, %19 : vector<1x16xf32>
    %22 = arith.divf %20, %21 : vector<1x16xf32>
    %23 = vector.shape_cast %22 : vector<1x16xf32> to vector<1x16x1xf32>
    %24 = vector.broadcast %23 : vector<1x16x1xf32> to vector<1x16x256xf32>
    %25 = arith.mulf %0, %24 : vector<1x16x256xf32>
    %c0_15 = arith.constant 0 : index
    %c0_16 = arith.constant 0 : index
    %c0_17 = arith.constant 0 : index
    %26 = vector.load %arg6[%c0_15, %c0_16, %c0_17] : memref<1x16x256xf32, #tpu.memory_space<vmem>>, vector<1x16x256xf32>
    tpu.vector_store %arg6[%c0_15, %c0_16, %c0_17], %25 {strides = array<i32>} : memref<1x16x256xf32, #tpu.memory_space<vmem>>, vector<1x16x256xf32>,
    return
  }
  func.func @transform_0(%arg0: i32) -> (i32, i32, i32) {
    %c0_i32 = arith.constant 0 : i32
    %c0_i32_0 = arith.constant 0 : i32
    %c0_i32_1 = arith.constant 0 : i32
    return %arg0, %c0_i32, %c0_i32_0 : i32, i32, i32
  }
  func.func @transform_1(%arg0: i32) -> (i32, i32) {
    %c0_i32 = arith.constant 0 : i32
    %c0_i32_0 = arith.constant 0 : i32
    %c0_i32_1 = arith.constant 0 : i32
    return %c0_i32, %c0_i32_0 : i32, i32
  }
  func.func @transform_2(%arg0: i32) -> (i32, i32) {
    %c0_i32 = arith.constant 0 : i32
    %c0_i32_0 = arith.constant 0 : i32
    %c0_i32_1 = arith.constant 0 : i32
    return %c0_i32, %c0_i32_0 : i32, i32
  }
  func.func @transform_3(%arg0: i32) -> (i32, i32) {
    %c0_i32 = arith.constant 0 : i32
    %c0_i32_0 = arith.constant 0 : i32
    %c0_i32_1 = arith.constant 0 : i32
    return %c0_i32, %c0_i32_0 : i32, i32
  }
  func.func @transform_4(%arg0: i32) -> (i32, i32) {
    %c0_i32 = arith.constant 0 : i32
    %c0_i32_0 = arith.constant 0 : i32
    %c0_i32_1 = arith.constant 0 : i32
    return %c0_i32, %c0_i32_0 : i32, i32
  }
  func.func @transform_5(%arg0: i32) -> (i32, i32, i32) {
    %c0_i32 = arith.constant 0 : i32
    %c0_i32_0 = arith.constant 0 : i32
    %c0_i32_1 = arith.constant 0 : i32
    return %arg0, %c0_i32, %c0_i32_0 : i32, i32, i32
  }
}

</mosaic_0001>

<bundles_post_ra>
// kernel: tpu_custom_call.1
= control target key start
LH: loop header
LB: loop body
LE: loop exit
PB: predicated region body
PF: predicated region fallthrough
CT: control target
= control target key end

     0   :  { %10 = vsyncpa [#allocation3], 0  ;;  %s982_s0 = inlined_call_operand.hbm [shape: f32[2,16,256], index: 0, kind: input, shape index: {}]   ;;  %s983_s1 = inlined_call_operand.vmem [shape: f32[16,4], index: 1, kind: input, shape index: {}]   ;;  %s984_s2 = inlined_call_operand.vmem [shape: f32[1,4], index: 2, kind: input, shape index: {}]   ;;  %s985_s3 = inlined_call_operand.vmem [shape: f32[4,16], index: 3, kind: input, shape index: {}]   ;;  %s986_s4 = inlined_call_operand.vmem [shape: f32[1,16], index: 4, kind: input, shape index: {}]   ;;  %s987_s5 = inlined_call_operand.hbm [shape: f32[2,16,256], index: 5, kind: output, shape index: {}]  }
   0x1   :  { %12 = vsyncpa [#allocation3 + $0x1], 0 }
   0x2   :  { %13 = vsyncpa [#allocation4], 0 }
   0x3   :  { %15 = vsyncpa [#allocation4 + $0x1], 0  ;;  %s785_s18 = smov 0   ;;  %s787_s19 = smov 0  }
   0x4   :  { %s789_s20 = smov 0   ;;  %s791_s21 = smov 0  }
   0x5 LB: > { %s806_s22 = sadd.s32 4294967295, %s744_s21   ;;  %s546_s23 = sadd.s32 4294967294, %s744_s21   ;;  %s744_s21 = sphi %s791_s21, %s1000_s21   ;;  %s740_s20 = sphi %s789_s20, %s999_s20   ;;  %s736_s19 = sphi %s787_s19, %s998_s19   ;;  %s732_s18 = sphi %s785_s18, %s997_s18  }
   0x6   : > { %s810_s24 = sadd.s32 1, %s744_s21   ;;  %s28_s25 = sadd.s32 1, %s740_s20 }
   0x7   : > { %s25_s26 = ssub.s32 %s744_s21, %s810_s24  ;;  %p35_p0 = scmp.ne.s32.totalorder %s740_s20, %s736_s19 }
   0x8   : > { %p26_p1 = scmp.eq.s32.totalorder %s25_s26, 0  ;;  %p36_p2 = scmp.eq.s32.totalorder %s744_s21, 0 }
   0x9   : > { %p41_p3 = scmp.ne.s32.totalorder %s736_s19, %s732_s18  ;;  %p42_p4 = scmp.eq.s32.totalorder %s806_s22, 0 }
   0xa   : > { %s822_s27 = scalar_select %p26_p1, %s740_s20, %s28_s25  }
   0xb   : > { %p824_p5 = por %p36_p2, %p35_p0  ;;  %p828_p6 = por %p42_p4, %p41_p3 }
   0xc   : > { %p149_p7 = scmp.eq.s32.totalorder %s806_s22, 1  ;;  %p155_p8 = scmp.eq.s32.totalorder %s546_s23, 1 }
   0xd   : > { %p599_p10 = scmp.lt.s32.totalorder %s744_s21, 2  ;;  %s187_s7 = sand.u32 1, %s740_s20  }
   0xe   : > { %p835_p11 = por %p149_p7, %p35_p0  ;;  %p839_p12 = por %p155_p8, %p41_p3 }
   0xf   : > { %s565_s8 = sshll.u32 %s744_s21, 9  ;;  %s549_s9 = sshll.u32 %s187_s7, 5 }
  0x10   : > { %s991_s30 = scalar_select %p835_p11, 1, 0 }
  0x11   : > { %s992_s6 = scalar_select %p839_p12, 1, 0 }
  0x12   : > { %s848_s12 = scalar_lea.hbm %s982_s0, %s565_s8  ;;  %s191_s13 = scalar_lea.vmem [#allocation2], %s549_s9 }
  0x13   : > { %s198_s14 = sshll.u32 %s191_s13, 4  ;;  %p852_p13 = pnand %p599_p10, %p824_p5  ;;  %s856_s14 = int_to_ptr.vmem [resolvable:$true] %s198_s14 }
  0x14   : > { %s858_s16 = scalar_lea.sflag [#allocation3], %s187_s7  ;;  %s648_s17 = scalar_lea.hbm %s848_s12, 512 }
  0x15   : > { %p649_p0 = scmp.ne.s32.totalorder %s848_s12, %s648_s17  ;;  %p650_p1 = pneg %p852_p13 }
  0x16   : > { %s653_s26 = scalar_lea.hbm %s982_s0, 1024  ;;  %p654_p4 = scmp.lt.u32.totalorder %s848_s12, %s982_s0 }
  0x17   : > { %p651_p2 = pnand %p650_p1, %p649_p0  ;;  %p655_p5 = scmp.lt.u32.totalorder %s653_s26, %s648_s17 }
  0x18   : > { %p657_p8 = scmp.lt.u32.totalorder %s648_s17, %s848_s12 }
  0x19   : > { %p652_p3 = pneg %p651_p2  ;;  %p656_p7 = por %p655_p5, %p654_p4 }
  0x1b   : > { %p658_p10 = por %p657_p8, %p656_p7 }
  0x1d   : > { %p659_p9 = pnand %p658_p10, %p652_p3 }
  0x1f   : > { %662 = shalt.err (!%p659_p9)
}
  0x20   : > { %s663_s7 = scalar_lea.vmem %s856_s14, 512  ;;  %s746_s9 = smov [#allocation2]  }
  0x21   : > { %p664_p0 = scmp.ne.s32.totalorder %s856_s14, %s663_s7  ;;  %s668_s10 = sshll.u32 %s746_s9, 4  ;;  %s669_s10 = int_to_ptr.vmem [resolvable:$false] %s668_s10 }
  0x22   : > { %s670_s11 = scalar_lea.vmem %s669_s10, 1024  ;;  %p671_p11 = scmp.lt.s32.totalorder %s856_s14, %s669_s10 }
  0x23   : > { %p666_p2 = pnand %p664_p0, %p650_p1  ;;  %p672_p4 = scmp.lt.s32.totalorder %s670_s11, %s663_s7 }
  0x25   : > { %p667_p12 = pneg %p666_p2  ;;  %p673_p5 = por %p672_p4, %p671_p11 }
  0x27   : > { %p674_p7 = pnand %p673_p5, %p667_p12 }
  0x29   : > { %677 = shalt.err (!%p674_p7)
}
  0x2a   : > { %s747_s13 = smov 256   ;;  %s748_s17 = smov 16  }
  0x2b   : > { %594 = dma.hbm_to_vmem [thread:$0]  (!%p852_p13), %s848_s12, 512, %s856_s14, %s858_s16, %s747_s13, %s747_s13, %s748_s17  }
  0x2c   : > { %p552_p9 = scmp.ge.s32.totalorder %s744_s21, 1  ;;  %p206_p1 = scmp.lt.s32.totalorder %s744_s21, 3 }
  0x2e   : > { %p207_p3 = pnand %p552_p9, %p206_p1 }
  0x2f   : > { %s889_s23 = sand.u32 (!%p207_p3), 1, %s736_s19  }
  0x30   : > { %210 = sbr.rel (%p207_p3) target bundleno = 830 (0x33e), region = 40  ;;  %s553_s25 = sshll.u32 (!%p207_p3), %s889_s23, 5 }
  0x31   : > { %s213_s26 = scalar_lea.sflag (!%p207_p3), [#allocation3], %s889_s23  ;;  %s216_s28 = scalar_lea.vmem (!%p207_p3), [#allocation2], %s553_s25 }
  0x37   : > { %723 = dma.done.wait (%p828_p6), %s213_s26, 512  }
  0x38   : > { %725 = vsyncadd (%p828_p6), %s213_s26, 4294966784  ;;  %v899_v0 = vld [vmem:[%s216_s28] sm:$0xff]  ;;  %v901_v1 = vld [vmem:[%s216_s28 + $0x8] sm:$0xff]  ;;  %v749_v9 = vmov 0.0|0.0   ;;  %vm750_vm0 = vmmov 0   ;;  %v751_v10 = vmov 0.0   ;;  %v261_v11 = vlaneseq }
  0x39   : > { %v903_v2 = vld [vmem:[%s216_s28 + $0x10] sm:$0xff]  ;;  %v247_v3 = vadd.f32 %v901_v1, %v899_v0  ;;  %v907_v4 = vld [vmem:[%s216_s28 + $0x18] sm:$0xff]  ;;  %v256_v6 = vld [vmem:[%s983_s1] sm:$0xff]  ;;  %584 = vmatprep.subr.bf16.mxu0 %v749_v9  ;;  %576 = vmatprep.mubr.msk.f32.mxu0 %vm750_vm0, %v751_v10  ;;  %vm272_vm1 = vcmask 130112   ;;  %vm274_vm2 = vcmask 130048   ;;  %vm360_vm3 = vcmask 1043456  }
  0x3a   : > { %v250_v5 = vadd.f32 %v907_v4, %v903_v2  ;;  %v257_v7 = vld [vmem:[%s983_s1 + $0x8] sm:$0xff]  ;;  %579 = vmatprep.subr.mxu1 %v751_v10  ;;  %581 = vmatprep.mubr.msk.f32.mxu1 %vm750_vm0, %v751_v10  ;;  %v262_v12 = vand.u32 127, %v261_v11  ;;  %v264_v13 = vshrl.u32 %v261_v11, 7  ;;  %v354_v24 = vld [vmem:[%s985_s3] sm:$0xf]  ;;  %vm356_vm4 = vcmask 31744  }
  0x3b   : > { %248 = vadd.xlane.f32.xlu0 %v247_v3  ;;  %v585_v8 = vpack.c.bf16 %v257_v7, %v256_v6  ;;  %580 = vmatpush3.msk.msra.mxu1 %vm360_vm3, %v354_v24  ;;  %v258_v25 = vld [vmem:[%s984_s2] sm:$0x1]  ;;  %s242_s13 = scalar_lea.vmem [#allocation5], %s553_s25  ;;  %s566_s26 = sshll.u32 %s806_s22, 9 }
  0x3c   : > { %v267_v14 = vadd.s32 4294967288, %v262_v12  ;;  %v265_v16 = vsub.s32 %v262_v12, %v264_v13  ;;  %v355_v34 = vld [vmem:[%s986_s4] sm:$0x1]  ;;  %v442_v41 = vsub.s32 0, %v264_v13  ;;  %s473_s17 = sshll.u32 %s242_s13, 4  ;;  %s936_s25 = scalar_lea.hbm %s987_s5, %s566_s26  ;;  %s931_s17 = int_to_ptr.vmem [resolvable:$true] %s473_s17 }
  0x3d   : > { %586 = vmatpush3.bf16.msra.mxu0 %v585_v8  ;;  %s460_s22 = scalar_lea.sflag [#allocation4], %s889_s23  ;;  %s678_s14 = scalar_lea.vmem %s931_s17, 512 }
  0x3e   : > { %v270_v18 = vsub.s32 %v267_v14, %v264_v13  ;;  %p679_p6 = scmp.ne.s32.totalorder %s931_s17, %s678_s14  ;;  %p994_p11 = scmp.ne.s32.totalorder %s991_s30, 0 }
  0x3f   : > { %251 = vadd.xlane.f32.xlu0 %v250_v5  ;;  %s752_s29 = smov [#allocation5]  }
  0x40   : > { %p680_p12 = pnand %p679_p6, %p994_p11  ;;  %s682_s15 = sshll.u32 %s752_s29, 4  ;;  %s683_s15 = int_to_ptr.vmem [resolvable:$false] %s682_s15 }
  0x41   : > { %s684_s16 = scalar_lea.vmem %s683_s15, 1024  ;;  %p685_p8 = scmp.lt.s32.totalorder %s931_s17, %s683_s15 }
  0x42   : > { %p681_p13 = pneg %p680_p12  ;;  %p686_p10 = scmp.lt.s32.totalorder %s684_s16, %s678_s14 }
  0x44   : > { %p687_p0 = por %p686_p10, %p685_p8 }
  0x46   : > { %p688_p2 = pnand %p687_p0, %p681_p13 }
  0xc8   : > { %v249_v15 = vpop.xlane.xlu0 %248 }
  0xc9   : > { %v254_v17 = vmul.f32 0.00390625, %v249_v15 }
  0xcb   : > { %v266_v21 = vrot.slane %v254_v17, %v265_v16 }
  0xcc   : > { %v252_v19 = vpop.xlane.xlu0 %251 }
  0xcd   : > { %v255_v20 = vmul.f32 0.00390625, %v252_v19 }
  0xcf   : > { %v271_v22 = vrot.slane %v255_v20, %v270_v18 }
  0xd1   : > { %v273_v23 = vsel %vm272_vm1, %v271_v22, %v266_v21 }
  0xd2   : > { %577 = vmatmul.mubr.msk.f32.vlgmr.msra.gmra.mrb[0].mxu0 %vm274_vm2, %v273_v23 }
 0x1a5   : > { %v343_v26 = vpop.f32.mrb[0].mxu0 }
 0x1a6   : > { %v344_v27 = vadd.f32 %v343_v26, %v258_v25  ;;  %v578_v28 = vpop.f32.mrb[1].mxu0 }
 0x1a8   : > { %v556_v29 = vmul.f32 -1.442695, %v344_v27 }
 0x1aa   : > { %640 = vpow2.f32 %v556_v29 }
 0x1b4   : > { %v641_v30 = vpop.eup %640 }
 0x1b5   : > { %v350_v31 = vadd.f32 1.0, %v641_v30 }
 0x1b7   : > { %642 = vrcp.f32 %v350_v31 }
 0x1c1   : > { %v643_v32 = vpop.eup %642 }
 0x1c2   : > { %v353_v33 = vmul.f32 %v643_v32, %v344_v27 }
 0x1c4   : > { %582 = vmatmul.mubr.msk.f32.vlgmr.msra.gmra.mrb[0].mxu1 %vm356_vm4, %v353_v33 }
 0x297   : > { %v430_v35 = vpop.f32.mrb[0].mxu1 }
 0x298   : > { %v431_v36 = vadd.f32 %v430_v35, %v355_v34  ;;  %v583_v37 = vpop.f32.mrb[1].mxu1 }
 0x29a   : > { %v559_v38 = vmul.f32 -1.442695, %v431_v36 }
 0x29c   : > { %644 = vpow2.f32 %v559_v38 }
 0x2a6   : > { %v645_v39 = vpop.eup %644 }
 0x2a7   : > { %v437_v40 = vadd.f32 1.0, %v645_v39 }
 0x2a9   : > { %646 = vrcp.f32 %v437_v40 }
 0x2b3   : > { %v647_v42 = vpop.eup %646 }
 0x2b4   : > { %v443_v43 = vrot.slane %v647_v42, %v442_v41 }
 0x2b6   : > { %445 = vbcast.lane.b32.xlu1 %v443_v43, 256 }
 0x2ba   : > { %449 = vbcast.lane.b32.xlu1 %v443_v43, 264 }
 0x328   : > { %v446_v44 = vpop.permute.xlu1 %445 }
 0x329   : > { %v451_v45 = vmul.f32 %v446_v44, %v899_v0  ;;  %v452_v46 = vmul.f32 %v446_v44, %v901_v1 }
 0x32b   : > { %455 = vst [vmem:[%s242_s13] sm:$0xff] %v451_v45  ;;  %456 = vst [vmem:[%s242_s13 + $0x8] sm:$0xff] %v452_v46 }
 0x32c   : > { %v450_v47 = vpop.permute.xlu1 %449 }
 0x32d   : > { %v453_v48 = vmul.f32 %v450_v47, %v903_v2  ;;  %v454_v49 = vmul.f32 %v450_v47, %v907_v4 }
 0x32f   : > { %457 = vst [vmem:[%s242_s13 + $0x10] sm:$0xff] %v453_v48  ;;  %458 = vst [vmem:[%s242_s13 + $0x18] sm:$0xff] %v454_v49 }
 0x330   : > { %691 = shalt.err (!%p688_p2)
}
 0x331   : > { %s692_s8 = scalar_lea.hbm %s936_s25, 512  ;;  %s696_s10 = scalar_lea.hbm %s987_s5, 1024 }
 0x332   : > { %p693_p4 = scmp.ne.s32.totalorder %s936_s25, %s692_s8  ;;  %p697_p9 = scmp.lt.u32.totalorder %s936_s25, %s987_s5 }
 0x333   : > { %p698_p1 = scmp.lt.u32.totalorder %s696_s10, %s692_s8  ;;  %p700_p6 = scmp.lt.u32.totalorder %s692_s8, %s936_s25 }
 0x334   : > { %p694_p5 = pnand %p693_p4, %p994_p11 }
 0x335   : > { %p699_p3 = por %p698_p1, %p697_p9 }
 0x336   : > { %p695_p7 = pneg %p694_p5 }
 0x337   : > { %p701_p12 = por %p700_p6, %p699_p3 }
 0x339   : > { %p702_p13 = pnand %p701_p12, %p695_p7 }
 0x33b   : > { %705 = shalt.err (!%p702_p13)
}
 0x33c   : > { %s753_s26 = smov 256   ;;  %s754_s28 = smov 16  }
 0x33d   : > { %589 = dma.vmem_to_hbm [thread:$0]  (%p994_p11), %s931_s17, 512, %s936_s25, %s460_s22, %s753_s26, %s753_s26, %s754_s28  }
 0x33e PF: > { %s488_s12 = sand.u32 1, %s732_s18   ;;  %p995_p8 = scmp.ne.s32.totalorder %s992_s6, 0 }
 0x33f   : > { %p996_p10 = scmp.ge.s32.totalorder %s744_s21, 2  ;;  %s489_s14 = scalar_lea.sflag [#allocation4], %s488_s12 }
 0x341   : > { %p596_p0 = pnand %p996_p10, %p995_p8 }
 0x343   : > { %727 = dma.done.wait (!%p596_p0), %s489_s14, 512  }
 0x344   : > { %729 = vsyncadd (!%p596_p0), %s489_s14, 4294966784  ;;  %p18_p2 = scmp.ge.s32.totalorder %s810_s24, 4   ;;  %s997_s18 = smov %s736_s19 }
 0x345   : > { %s998_s19 = smov %s740_s20  ;;  %s999_s20 = smov %s822_s27 }
 0x346   : > { %s1000_s21 = smov %s810_s24  ;;  %20 = sbr.rel (!%p18_p2) target bundleno = 5 (0x5), region = 85 }
 0x34d   :  { %494 = vsyncpa [#allocation3], 1 }
 0x34e   :  { %496 = vsyncpa [#allocation3 + $0x1], 1 }
 0x34f   :  { %497 = vsyncpa [#allocation4], 1 }
 0x350   :  { %499 = vsyncpa [#allocation4 + $0x1], 1 }

</bundles_post_ra>
